<compile_context>
chip_gen: v7x
topology: tpu7x:2x2x1
jax: 0.10.0
libtpu: 0.0.40
codegen_flags: <defaults>
</compile_context>

<pallas_src>
import functools

import jax
import jax.numpy as jnp
from jax import lax
from jax.experimental import pallas as pl
from jax.experimental.pallas import tpu as pltpu


def _cdiv(a, b):
    return -(-a // b)


def _round_up(x, m):
    return ((x + m - 1) // m) * m


# -----------------------------------------------------------------------------
# Kernel.  grid = (row tiles i, filter slabs f); f is the trailing reduction axis.
# The fp32 output block is resident across f and doubles as the accumulator.
# -----------------------------------------------------------------------------
def _ffn_kernel(x_ref, g_ref, b_ref, w1_ref, b1_ref, w2_ref, b2_ref,
                o_ref, xn_ref, *, eps):
    f = pl.program_id(1)

    @pl.when(f == 0)
    def _init():
        # LayerNorm once per row tile; cache the bf16 result for the MXU.
        x = x_ref[...].astype(jnp.float32)
        mean = jnp.mean(x, axis=-1, keepdims=True)
        c = x - mean
        var = jnp.mean(c * c, axis=-1, keepdims=True)
        xn = (c * lax.rsqrt(var + eps)) * g_ref[...] + b_ref[...]
        xn_ref[...] = xn.astype(jnp.bfloat16)
        # Dropout(p=0) is identity; bias2 + residual folded into the accumulator init.
        # TODO(synk): train-mode stochastic dropout not implemented.
        o_ref[...] = x + b2_ref[...]

    # Linear1 slab with fused bias + ReLU; bf16 x bf16 -> fp32 on the MXU.
    h = jnp.maximum(
        jnp.dot(xn_ref[...], w1_ref[...], preferred_element_type=jnp.float32)
        + b1_ref[...], 0.0)
    # Linear2 slab, accumulated directly into the resident fp32 output block.
    o_ref[...] += jnp.dot(h.astype(jnp.bfloat16), w2_ref[...],
                          preferred_element_type=jnp.float32)


# -----------------------------------------------------------------------------
# Tiling / VMEM budgeting
# -----------------------------------------------------------------------------
def _vmem_limit_bytes():
    cap = 64 * 2 ** 20
    try:
        cap = int(pltpu.get_tpu_info().vmem_capacity_bytes)
    except Exception:
        pass
    cap = max(cap, 64 * 2 ** 20)          # never starve v5e/v6e below v7x's physical
    return int(0.8 * cap)                 # ~20% headroom for Mosaic internal scratch


def _select_tiles(M, D, F, tm, tf, budget, force_tf):
    Fp0 = _round_up(F, 128)

    def est(tm_, tf_):
        return (4 * tm_ * D * 4                                 # x + out tiles, double-buffered fp32
                + 2 * (D * tf_ * 2 + tf_ * D * 2 + tf_ * 4)     # w1/w2/b1 slabs, double-buffered
                + tm_ * D * 2                                   # bf16 LayerNorm cache (scratch)
                + tm_ * tf_ * 6                                 # hidden fp32 + bf16 temporaries
                + 6 * D * 4                                     # gamma / beta / b2
                + 2 * 2 ** 20)                                  # Mosaic scratch headroom

    if force_tf is not None:
        cands = [min(_round_up(force_tf, 128), Fp0)]
    else:
        cands = [Fp0]                                           # resident weights (single f step)
        t = max(128, (tf // 128) * 128)
        while t >= 128:
            c = min(t, Fp0)
            if c not in cands:
                cands.append(c)
            t //= 2

    # Balanced row tiles; >=2 tiles when M allows it (feeds both v7x TensorCores).
    n_tiles = 1 if M < 16 else max(2, _cdiv(M, tm))
    while True:
        tm_eff = _round_up(_cdiv(M, n_tiles), 8)
        for c in cands:
            if est(tm_eff, c) <= budget:
                return n_tiles, tm_eff, c
        if tm_eff <= 8:
            return n_tiles, tm_eff, cands[-1]                   # last resort (tiny tiles)
        n_tiles *= 2


# -----------------------------------------------------------------------------
# Public wrapper
# -----------------------------------------------------------------------------
def transformer_feed_forward(x, gamma, beta, w1, b1, w2, b2, *,
                             eps=1e-5, tm=512, tf=1024, force_tf=None):
    """x: (B, S, D).  w1: (D, F), w2: (F, D)  (i.e. torch weights transposed).
    Residual add requires hidden_size == input_size (== D)."""
    B, S, D = x.shape
    F = w1.shape[1]
    assert w1.shape == (D, F) and w2.shape == (F, D)
    M = B * S

    vmem_limit = _vmem_limit_bytes()
    nm, tm_eff, tf_eff = _select_tiles(M, D, F, tm, tf, vmem_limit, force_tf)
    Mp = nm * tm_eff
    Fp = _round_up(F, tf_eff)
    nf = Fp // tf_eff

    # ---- pack / cast / pad inputs -------------------------------------------
    x2 = x.reshape(M, D)
    if Mp != M:
        x2 = jnp.pad(x2, ((0, Mp - M), (0, 0)))
    g2 = gamma.reshape(1, D).astype(jnp.float32)
    be2 = beta.reshape(1, D).astype(jnp.float32)
    w1b = w1.astype(jnp.bfloat16)                    # bf16 weights: half the DMA / VMEM
    w2b = w2.astype(jnp.bfloat16)
    b1r = b1.reshape(1, F).astype(jnp.float32)
    if Fp != F:                                      # zero-padded filter dim is an exact no-op
        w1b = jnp.pad(w1b, ((0, 0), (0, Fp - F)))
        w2b = jnp.pad(w2b, ((0, Fp - F), (0, 0)))
        b1r = jnp.pad(b1r, ((0, 0), (0, Fp - F)))
    b2r = b2.reshape(1, D).astype(jnp.float32)

    # Weights are fetched once when resident (nf == 1), else re-streamed per row tile.
    weight_bytes = (1 if nf == 1 else nm) * 2 * D * Fp * 2
    cost = pl.CostEstimate(
        flops=4 * Mp * D * Fp + 10 * Mp * D,
        transcendentals=Mp,
        bytes_accessed=2 * Mp * D * 4 + weight_bytes,
    )

    out = pl.pallas_call(
        functools.partial(_ffn_kernel, eps=eps),
        out_shape=jax.ShapeDtypeStruct((Mp, D), jnp.float32),
        grid_spec=pltpu.PrefetchScalarGridSpec(
            num_scalar_prefetch=0,
            grid=(nm, nf),                                         # reduction axis last
            in_specs=[
                pl.BlockSpec((tm_eff, D), lambda i, f: (i, 0)),    # x rows
                pl.BlockSpec((1, D), lambda i, f: (0, 0)),         # gamma
                pl.BlockSpec((1, D), lambda i, f: (0, 0)),         # beta
                pl.BlockSpec((D, tf_eff), lambda i, f: (0, f)),    # w1 slab
                pl.BlockSpec((1, tf_eff), lambda i, f: (0, f)),    # b1 slab
                pl.BlockSpec((tf_eff, D), lambda i, f: (f, 0)),    # w2 slab
                pl.BlockSpec((1, D), lambda i, f: (0, 0)),         # b2
            ],
            out_specs=pl.BlockSpec((tm_eff, D), lambda i, f: (i, 0)),
            scratch_shapes=[
                pltpu.VMEM((tm_eff, D), jnp.bfloat16),             # cached LayerNorm(x)
            ],
        ),
        compiler_params=pltpu.CompilerParams(
            dimension_semantics=("parallel", "arbitrary"),
            vmem_limit_bytes=vmem_limit),
        cost_estimate=cost,
    )(x2, g2, be2, w1b, b1r, w2b, b2r)

    return out[:M].reshape(B, S, D).astype(x.dtype)


# -----------------------------------------------------------------------------
# Self-test
# -----------------------------------------------------------------------------
def _xavier_uniform(key, fan_in, fan_out, dtype=jnp.float32):
    # matches torch.nn.init.xavier_uniform_ (gain=1)
    limit = (6.0 / (fan_in + fan_out)) ** 0.5
    return jax.random.uniform(key, (fan_in, fan_out), dtype=dtype,
                              minval=-limit, maxval=limit)


def _reference(x, gamma, beta, w1, b1, w2, b2, eps=1e-5):
    mean = jnp.mean(x, axis=-1, keepdims=True)
    var = jnp.mean((x - mean) ** 2, axis=-1, keepdims=True)
    xn = (x - mean) / jnp.sqrt(var + eps) * gamma + beta
    h = jnp.maximum(xn @ w1 + b1, 0.0)
    return h @ w2 + b2 + x


if __name__ == "__main__":
    def _run_case(key, B, S, D, Fdim, tol=5e-2, **kw):
        kx, kg, kb, k1, kb1, k2, kb2 = jax.random.split(key, 7)
        x = jax.random.normal(kx, (B, S, D), dtype=jnp.float32)
        gamma = 1.0 + 0.1 * jax.random.normal(kg, (D,), jnp.float32)
        beta = 0.1 * jax.random.normal(kb, (D,), jnp.float32)
        w1 = _xavier_uniform(k1, D, Fdim)                  # (D, F) = torch W1.T
        b1 = jax.random.uniform(kb1, (Fdim,), jnp.float32,
                                minval=-1.0 / D ** 0.5, maxval=1.0 / D ** 0.5)
        w2 = _xavier_uniform(k2, Fdim, D)                  # (F, D) = torch W2.T
        b2 = jax.random.uniform(kb2, (D,), jnp.float32,
                                minval=-1.0 / Fdim ** 0.5, maxval=1.0 / Fdim ** 0.5)

        out = jax.block_until_ready(
            transformer_feed_forward(x, gamma, beta, w1, b1, w2, b2, **kw))
        ref = _reference(x, gamma, beta, w1, b1, w2, b2)
        assert out.shape == (B, S, D)
        # bf16 matmul operands (fp32 accumulation) -> loosened tolerance vs fp32 ref.
        max_err = float(jnp.max(jnp.abs(out - ref)))
        assert jnp.allclose(out, ref, atol=tol, rtol=tol), (B, S, D, Fdim, max_err)

    root = jax.random.PRNGKey(0)
    ka, kb_, kc = jax.random.split(root, 3)
    # module-sized small config (inference dropout p=0): input=hidden=32, filter=64
    _run_case(ka, 2, 8, 32, 64)
    # resident-weight fast path with nm>=2 row split (megacore)
    _run_case(kb_, 2, 256, 128, 1024)
    # forced F-axis tiling + filter padding + ragged M (exercises multi-slab accumulation)
    _run_case(kc, 1, 300, 256, 1400, tol=8e-2, force_tf=512)
    print("KERNEL_OK")
</pallas_src>

<mosaic_0001>
module attributes {stable_mosaic.version = 11 : i64} {
  func.func @_ffn_kernel(%arg0: i32, %arg1: i32, %arg2: memref<8x32xf32, #tpu.memory_space<vmem>>, %arg3: memref<1x32xf32, #tpu.memory_space<vmem>>, %arg4: memref<1x32xf32, #tpu.memory_space<vmem>>, %arg5: memref<32x128xbf16, #tpu.memory_space<vmem>>, %arg6: memref<1x128xf32, #tpu.memory_space<vmem>>, %arg7: memref<128x32xbf16, #tpu.memory_space<vmem>>, %arg8: memref<1x32xf32, #tpu.memory_space<vmem>>, %arg9: memref<8x32xf32, #tpu.memory_space<vmem>>, %arg10: memref<8x32xbf16, #tpu.memory_space<vmem>>) attributes {dimension_semantics = [#tpu.dimension_semantics<parallel>, #tpu.dimension_semantics<arbitrary>], iteration_bounds = array<i64: 2, 1>, scalar_prefetch = 0 : i64, scratch_operands = 1 : i64, tpu.core_type = #tpu.core_type<tc>, window_params = [{transform_indices = @transform_0, window_bounds = array<i64: 8, 32>}, {pipeline_mode = #tpu.pipeline_mode<synchronous>, transform_indices = @transform_1, window_bounds = array<i64: 1, 32>}, {pipeline_mode = #tpu.pipeline_mode<synchronous>, transform_indices = @transform_2, window_bounds = array<i64: 1, 32>}, {transform_indices = @transform_3, window_bounds = array<i64: 32, 128>}, {transform_indices = @transform_4, window_bounds = array<i64: 1, 128>}, {transform_indices = @transform_5, window_bounds = array<i64: 128, 32>}, {pipeline_mode = #tpu.pipeline_mode<synchronous>, transform_indices = @transform_6, window_bounds = array<i64: 1, 32>}, {transform_indices = @transform_7, window_bounds = array<i64: 8, 32>}]} {
    %c0_i32 = arith.constant 0 : i32
    %0 = arith.cmpi eq, %arg1, %c0_i32 : i32
    %1 = arith.extui %0 : i1 to i32
    %c0_i32_0 = arith.constant 0 : i32
    %2 = arith.cmpi ne, %1, %c0_i32_0 : i32
    scf.if %2 {
      %c0_14 = arith.constant 0 : index
      %c0_15 = arith.constant 0 : index
      %17 = vector.load %arg2[%c0_14, %c0_15] : memref<8x32xf32, #tpu.memory_space<vmem>>, vector<8x32xf32>
      %cst_16 = arith.constant dense<0.000000e+00> : vector<8xf32>
      %18 = vector.multi_reduction <add>, %17, %cst_16 [1] : vector<8x32xf32> to vector<8xf32>
      %19 = vector.shape_cast %18 : vector<8xf32> to vector<8x1xf32>
      %cst_17 = arith.constant 3.200000e+01 : f32
      %20 = vector.broadcast %cst_17 : f32 to vector<8x1xf32>
      %21 = arith.divf %19, %20 : vector<8x1xf32>
      %22 = vector.broadcast %21 : vector<8x1xf32> to vector<8x32xf32>
      %23 = arith.subf %17, %22 : vector<8x32xf32>
      %24 = arith.mulf %23, %23 : vector<8x32xf32>
      %cst_18 = arith.constant dense<0.000000e+00> : vector<8xf32>
      %25 = vector.multi_reduction <add>, %24, %cst_18 [1] : vector<8x32xf32> to vector<8xf32>
      %26 = vector.shape_cast %25 : vector<8xf32> to vector<8x1xf32>
      %cst_19 = arith.constant 3.200000e+01 : f32
      %27 = vector.broadcast %cst_19 : f32 to vector<8x1xf32>
      %28 = arith.divf %26, %27 : vector<8x1xf32>
      %cst_20 = arith.constant 9.99999974E-6 : f32
      %29 = vector.broadcast %cst_20 : f32 to vector<8x1xf32>
      %30 = arith.addf %28, %29 : vector<8x1xf32>
      %31 = math.rsqrt %30 : vector<8x1xf32>
      %32 = vector.broadcast %31 : vector<8x1xf32> to vector<8x32xf32>
      %33 = arith.mulf %23, %32 : vector<8x32xf32>
      %c0_21 = arith.constant 0 : index
      %c0_22 = arith.constant 0 : index
      %34 = vector.load %arg3[%c0_21, %c0_22] : memref<1x32xf32, #tpu.memory_space<vmem>>, vector<1x32xf32>
      %35 = vector.broadcast %34 : vector<1x32xf32> to vector<8x32xf32>
      %36 = arith.mulf %33, %35 : vector<8x32xf32>
      %c0_23 = arith.constant 0 : index
      %c0_24 = arith.constant 0 : index
      %37 = vector.load %arg4[%c0_23, %c0_24] : memref<1x32xf32, #tpu.memory_space<vmem>>, vector<1x32xf32>
      %38 = vector.broadcast %37 : vector<1x32xf32> to vector<8x32xf32>
      %39 = arith.addf %36, %38 : vector<8x32xf32>
      %40 = arith.truncf %39 : vector<8x32xf32> to vector<8x32xbf16>
      %c0_25 = arith.constant 0 : index
      %c0_26 = arith.constant 0 : index
      %41 = vector.load %arg10[%c0_25, %c0_26] : memref<8x32xbf16, #tpu.memory_space<vmem>>, vector<8x32xbf16>
      tpu.vector_store %arg10[%c0_25, %c0_26], %40 {strides = array<i32>} : memref<8x32xbf16, #tpu.memory_space<vmem>>, vector<8x32xbf16>,
      %c0_27 = arith.constant 0 : index
      %c0_28 = arith.constant 0 : index
      %42 = vector.load %arg8[%c0_27, %c0_28] : memref<1x32xf32, #tpu.memory_space<vmem>>, vector<1x32xf32>
      %43 = vector.broadcast %42 : vector<1x32xf32> to vector<8x32xf32>
      %44 = arith.addf %17, %43 : vector<8x32xf32>
      %c0_29 = arith.constant 0 : index
      %c0_30 = arith.constant 0 : index
      %45 = vector.load %arg9[%c0_29, %c0_30] : memref<8x32xf32, #tpu.memory_space<vmem>>, vector<8x32xf32>
      tpu.vector_store %arg9[%c0_29, %c0_30], %44 {strides = array<i32>} : memref<8x32xf32, #tpu.memory_space<vmem>>, vector<8x32xf32>,
    } else {
    }
    %c0 = arith.constant 0 : index
    %c0_1 = arith.constant 0 : index
    %3 = vector.load %arg10[%c0, %c0_1] : memref<8x32xbf16, #tpu.memory_space<vmem>>, vector<8x32xbf16>
    %c0_2 = arith.constant 0 : index
    %c0_3 = arith.constant 0 : index
    %4 = vector.load %arg5[%c0_2, %c0_3] : memref<32x128xbf16, #tpu.memory_space<vmem>>, vector<32x128xbf16>
    %cst = arith.constant dense<0.000000e+00> : vector<8x128xf32>
    %5 = tpu.matmul %3, %4, %cst {dimension_numbers = #tpu.dot_dimension_numbers<[1], [0], [0], [1], [0, 0, 1, 1], [], []>} : vector<8x32xbf16>, vector<32x128xbf16>, vector<8x128xf32> -> vector<8x128xf32>
    %c0_4 = arith.constant 0 : index
    %c0_5 = arith.constant 0 : index
    %6 = vector.load %arg6[%c0_4, %c0_5] : memref<1x128xf32, #tpu.memory_space<vmem>>, vector<1x128xf32>
    %7 = vector.broadcast %6 : vector<1x128xf32> to vector<8x128xf32>
    %8 = arith.addf %5, %7 : vector<8x128xf32>
    %cst_6 = arith.constant 0.000000e+00 : f32
    %9 = vector.broadcast %cst_6 : f32 to vector<8x128xf32>
    %10 = arith.maximumf %8, %9 : vector<8x128xf32>
    %c0_7 = arith.constant 0 : index
    %c0_8 = arith.constant 0 : index
    %11 = vector.load %arg9[%c0_7, %c0_8] : memref<8x32xf32, #tpu.memory_space<vmem>>, vector<8x32xf32>
    %12 = arith.truncf %10 : vector<8x128xf32> to vector<8x128xbf16>
    %c0_9 = arith.constant 0 : index
    %c0_10 = arith.constant 0 : index
    %13 = vector.load %arg7[%c0_9, %c0_10] : memref<128x32xbf16, #tpu.memory_space<vmem>>, vector<128x32xbf16>
    %cst_11 = arith.constant dense<0.000000e+00> : vector<8x32xf32>
    %14 = tpu.matmul %12, %13, %cst_11 {dimension_numbers = #tpu.dot_dimension_numbers<[1], [0], [0], [1], [0, 0, 1, 1], [], []>} : vector<8x128xbf16>, vector<128x32xbf16>, vector<8x32xf32> -> vector<8x32xf32>
    %15 = arith.addf %11, %14 : vector<8x32xf32>
    %c0_12 = arith.constant 0 : index
    %c0_13 = arith.constant 0 : index
    %16 = vector.load %arg9[%c0_12, %c0_13] : memref<8x32xf32, #tpu.memory_space<vmem>>, vector<8x32xf32>
    tpu.vector_store %arg9[%c0_12, %c0_13], %15 {strides = array<i32>} : memref<8x32xf32, #tpu.memory_space<vmem>>, vector<8x32xf32>,
    return
  }
  func.func @transform_0(%arg0: i32, %arg1: i32) -> (i32, i32) {
    %c0_i32 = arith.constant 0 : i32
    %c0_i32_0 = arith.constant 0 : i32
    return %arg0, %c0_i32 : i32, i32
  }
  func.func @transform_1(%arg0: i32, %arg1: i32) -> (i32, i32) {
    %c0_i32 = arith.constant 0 : i32
    %c0_i32_0 = arith.constant 0 : i32
    %c0_i32_1 = arith.constant 0 : i32
    return %c0_i32, %c0_i32_0 : i32, i32
  }
  func.func @transform_2(%arg0: i32, %arg1: i32) -> (i32, i32) {
    %c0_i32 = arith.constant 0 : i32
    %c0_i32_0 = arith.constant 0 : i32
    %c0_i32_1 = arith.constant 0 : i32
    return %c0_i32, %c0_i32_0 : i32, i32
  }
  func.func @transform_3(%arg0: i32, %arg1: i32) -> (i32, i32) {
    %c0_i32 = arith.constant 0 : i32
    %c0_i32_0 = arith.constant 0 : i32
    return %c0_i32, %arg1 : i32, i32
  }
  func.func @transform_4(%arg0: i32, %arg1: i32) -> (i32, i32) {
    %c0_i32 = arith.constant 0 : i32
    %c0_i32_0 = arith.constant 0 : i32
    return %c0_i32, %arg1 : i32, i32
  }
  func.func @transform_5(%arg0: i32, %arg1: i32) -> (i32, i32) {
    %c0_i32 = arith.constant 0 : i32
    %c0_i32_0 = arith.constant 0 : i32
    return %arg1, %c0_i32 : i32, i32
  }
  func.func @transform_6(%arg0: i32, %arg1: i32) -> (i32, i32) {
    %c0_i32 = arith.constant 0 : i32
    %c0_i32_0 = arith.constant 0 : i32
    %c0_i32_1 = arith.constant 0 : i32
    return %c0_i32, %c0_i32_0 : i32, i32
  }
  func.func @transform_7(%arg0: i32, %arg1: i32) -> (i32, i32) {
    %c0_i32 = arith.constant 0 : i32
    %c0_i32_0 = arith.constant 0 : i32
    return %arg0, %c0_i32 : i32, i32
  }
}

</mosaic_0001>

<bundles_post_ra>
// kernel: tpu_custom_call.1
= control target key start
LH: loop header
LB: loop body
LE: loop exit
PB: predicated region body
PF: predicated region fallthrough
CT: control target
= control target key end

     0   :  { %12 = vsyncpa [#allocation4], 0  ;;  %s1108_s0 = inlined_call_operand.vmem [shape: f32[16,32], index: 0, kind: input, shape index: {}]   ;;  %s1109_s1 = inlined_call_operand.vmem [shape: f32[1,32], index: 1, kind: input, shape index: {}]   ;;  %s1110_s2 = inlined_call_operand.vmem [shape: f32[1,32], index: 2, kind: input, shape index: {}]   ;;  %s1111_s3 = inlined_call_operand.vmem [shape: bf16[32,128], index: 3, kind: input, shape index: {}]   ;;  %s1112_s4 = inlined_call_operand.vmem [shape: f32[1,128], index: 4, kind: input, shape index: {}]   ;;  %s1113_s5 = inlined_call_operand.vmem [shape: bf16[128,32], index: 5, kind: input, shape index: {}]   ;;  %s1114_s6 = inlined_call_operand.vmem [shape: f32[1,32], index: 6, kind: input, shape index: {}]   ;;  %s1115_s7 = inlined_call_operand.hbm [shape: f32[16,32], index: 7, kind: output, shape index: {}]  }
   0x1   :  { %14 = vsyncpa [#allocation4 + $0x1], 0  ;;  %s949_s24 = smov 0   ;;  %s951_s25 = smov 0  }
   0x2   :  { %s953_s26 = smov 0   ;;  %s955_s27 = smov 0  }
   0x3   :  { %s957_s28 = smov 0   ;;  %s959_s29 = smov 0  }
   0x4 LB: > { %s688_s30 = sadd.s32 4294967295, %s904_s29   ;;  %s689_s8 = sadd.s32 4294967294, %s904_s29   ;;  %s904_s29 = sphi %s959_s29, %s20_s29   ;;  %s900_s28 = sphi %s957_s28, %s1122_s28   ;;  %s896_s27 = sphi %s955_s27, %s1121_s27   ;;  %s892_s26 = sphi %s953_s26, %s1120_s26   ;;  %s888_s25 = sphi %s951_s25, %s1119_s25   ;;  %s884_s24 = sphi %s949_s24, %s1118_s24  }
   0x5   : > { %s32_s9 = sadd.s32 1, %s900_s28  ;;  %s206_s10 = sadd.s32 1, %s892_s26 }
   0x6   : > { %p34_p0 = scmp.ge.s32.totalorder %s32_s9, 2  ;;  %p216_p1 = scmp.ne.s32.totalorder %s892_s26, %s888_s25 }
   0x7   : > { %p217_p2 = scmp.eq.s32.totalorder %s688_s30, 1  ;;  %p222_p3 = scmp.ne.s32.totalorder %s888_s25, %s884_s24 }
   0x8   : > { %s1124_s9 = smov (%p34_p0, %s32_s9), 0  ;;  %p223_p5 = scmp.eq.s32.totalorder %s689_s8, 1 }
   0x9   : > { %p989_p4 = por %p217_p2, %p216_p1  ;;  %s203_s12 = ssub.s32 %s900_s28, %s1124_s9 }
   0xa   : > { %p695_p6 = scmp.ge.s32.totalorder %s904_s29, 1  ;;  %p204_p7 = scmp.eq.s32.totalorder %s203_s12, 0 }
   0xb   : > { %p996_p8 = por %p223_p5, %p222_p3  ;;  %p279_p9 = scmp.lt.s32.totalorder %s904_s29, 3 }
   0xc   : > { %s1002_s14 = scalar_select %p204_p7, %s892_s26, %s206_s10  }
   0xd   : > { %p280_p10 = pnand %p695_p6, %p279_p9 }
   0xe   : > { %p322_p11 = scmp.lt.s32.totalorder (!%p280_p10), %s896_s27, 1  ;;  %vm345_vm0 = vcmask (!%p280_p10), 261120   ;;  %v814_v7 = vld [vmem:[%s1111_s3] sm:$0xff] (!%p280_p10)   ;;  %v906_v8 = vmov (!%p280_p10), 0.0   ;;  %v815_v9 = vld [vmem:[%s1111_s3 + $0x8] sm:$0xff] (!%p280_p10)   ;;  %vm907_vm1 = vmmov (!%p280_p10), 0  }
   0xf   : > { %283 = sbr.rel (%p280_p10) target bundleno = 796 (0x31c), region = 48  ;;  %729 = vmatprep.subr.bf16.mxu0 (!%p280_p10), %v906_v8  ;;  %737 = vmatprep.subr.bf16.mxu1 (!%p280_p10), %v906_v8  ;;  %v816_v10 = vld [vmem:[%s1113_s5] sm:$0xff] (!%p280_p10)   ;;  %v817_v11 = vld [vmem:[%s1113_s5 + $0x8] sm:$0xff] (!%p280_p10)   ;;  %v818_v12 = vld [vmem:[%s1113_s5 + $0x10] sm:$0xff] (!%p280_p10)   ;;  %vm377_vm2 = vcmask (!%p280_p10), 257024   ;;  %s319_s20 = sand.u32 (!%p280_p10), 1, %s888_s25  }
  0x10   : > { %730 = vmatpush3.bf16.msra.mxu0 (!%p280_p10), %v814_v7  ;;  %733 = vmatprep.mubr.msk.bf16.mxu0 (!%p280_p10), %vm907_vm1, %v906_v8  ;;  %v819_v13 = vld [vmem:[%s1113_s5 + $0x18] sm:$0xff] (!%p280_p10)   ;;  %v820_v14 = vld [vmem:[%s1113_s5 + $0x20] sm:$0xff] (!%p280_p10)   ;;  %v821_v15 = vld [vmem:[%s1113_s5 + $0x28] sm:$0xff] (!%p280_p10)   ;;  %s696_s21 = sshll.u32 (!%p280_p10), %s319_s20, 3  ;;  %s714_s8 = sshll.u32 (!%p280_p10), %s896_s27, 7 }
  0x11   : > { %731 = vmatprep.subr.bf16.mxu0 (!%p280_p10), %v906_v8  ;;  %753 = vmatprep.mubr.msk.bf16.mxu1 (!%p280_p10), %vm907_vm1, %v906_v8  ;;  %v698_v20 = vld [vmem:[%s1109_s1] ss:$0 sm:$0xff] (!%p280_p10)  ;;  %v822_v27 = vld [vmem:[%s1113_s5 + $0x30] sm:$0xff] (!%p280_p10)   ;;  %v823_v28 = vld [vmem:[%s1113_s5 + $0x38] sm:$0xff] (!%p280_p10)   ;;  %s321_s22 = scalar_lea.vmem (!%p280_p10), [#allocation3], %s696_s21  ;;  %s566_s17 = scalar_lea.sflag (!%p280_p10), [#allocation4], %s319_s20 }
  0x12   : > { %738 = vmatpush3.bf16.msra.mxu1 (!%p280_p10), %v816_v10  ;;  %v699_v22 = vld [vmem:[%s1110_s2] ss:$0 sm:$0xff] (!%p280_p10)  ;;  %s579_s10 = sshll.u32 (!%p280_p10), %s321_s22, 4  ;;  %s908_s18 = smov (!%p280_p10), [#allocation3]   ;;  %s1062_s10 = int_to_ptr.vmem [resolvable:$true] %s579_s10 }
  0x13   : > { %739 = vmatprep.subr.bf16.mxu1 (!%p280_p10), %v906_v8  ;;  %v700_v29 = vld [vmem:[%s1114_s6] ss:$0 sm:$0xff] (!%p280_p10) }
  0x14   : > { %732 = vmatpush3.bf16.msra.mxu0 (!%p280_p10), %v815_v9  ;;  %v701_v31 = vld [vmem:[%s1112_s4] ss:$0 sm:$0xff] (!%p280_p10) }
  0x16   : > { %s323_s15 = scalar_select %p322_p11, %s896_s27, 1  ;;  %740 = vmatpush3.bf16.msra.mxu1 %v817_v11 }
  0x17   : > { %741 = vmatprep.subr.bf16.mxu1 %v906_v8  ;;  %s826_s27 = scalar_lea.vmem %s1062_s10, 128 }
  0x18   : > { %s697_s16 = sshll.u32 %s323_s15, 3  ;;  %p827_p12 = scmp.ne.s32.totalorder %s1062_s10, %s826_s27 }
  0x19   : > { %s325_s19 = scalar_lea.vmem %s1108_s0, %s697_s16  ;;  %s1060_s16 = scalar_lea.hbm %s1115_s7, %s714_s8 }
  0x1a   : > { %v344_v0 = vld [vmem:[%s325_s19] sm:$0xff]  ;;  %742 = vmatpush3.bf16.msra.mxu1 %v818_v12  ;;  %p828_p13 = pnand %p827_p12, %p989_p4  ;;  %s830_s19 = sshll.u32 %s908_s18, 4  ;;  %s831_s19 = int_to_ptr.vmem [resolvable:$false] %s830_s19 }
  0x1b   : > { %v346_v1 = vsel %vm345_vm0, %v344_v0, 0.0  ;;  %743 = vmatprep.subr.bf16.mxu1 %v906_v8  ;;  %v386_v30 = vadd.f32 %v700_v29, %v344_v0  ;;  %s832_s21 = scalar_lea.vmem %s831_s19, 256  ;;  %p833_p1 = scmp.lt.s32.totalorder %s1062_s10, %s831_s19 }
  0x1c   : > { %347 = vadd.xlane.f32.xlu0 %v346_v1  ;;  %p829_p0 = pneg %p828_p13  ;;  %p834_p2 = scmp.lt.s32.totalorder %s832_s21, %s826_s27 }
  0x1d   : > { %387 = vst.msk [vmem:[%s321_s22] sm:$0xff] %vm345_vm0, %v386_v30 }
  0x1e   : > { %744 = vmatpush3.bf16.msra.mxu1 %v819_v13  ;;  %p835_p3 = por %p834_p2, %p833_p1 }
  0x1f   : > { %745 = vmatprep.subr.bf16.mxu1 %v906_v8 }
  0x20   : > { %p836_p5 = pnand %p835_p3, %p829_p0 }
  0x22   : > { %746 = vmatpush3.bf16.msra.mxu1 %v820_v14 }
  0x23   : > { %747 = vmatprep.subr.bf16.mxu1 %v906_v8 }
  0x24   : > { %v457_v39 = vld [vmem:[%s321_s22] sm:$0xff] }
  0x26   : > { %748 = vmatpush3.bf16.msra.mxu1 %v821_v15 }
  0x27   : > { %749 = vmatprep.subr.bf16.mxu1 %v906_v8 }
  0x2a   : > { %750 = vmatpush3.bf16.msra.mxu1 %v822_v27 }
  0x2b   : > { %751 = vmatprep.subr.bf16.mxu1 %v906_v8 }
  0x2e   : > { %752 = vmatpush3.bf16.msra.mxu1 %v823_v28 }
  0xa9   : > { %v348_v2 = vpop.xlane.xlu0 %347 }
  0xaa   : > { %v350_v3 = vmul.f32 0.03125, %v348_v2 }
  0xac   : > { %v351_v4 = vsub.f32 %v344_v0, %v350_v3 }
  0xae   : > { %v352_v5 = vmul.f32 %v351_v4, %v351_v4 }
  0xb0   : > { %v353_v6 = vsel %vm345_vm0, %v352_v5, 0.0 }
  0xb1   : > { %354 = vadd.xlane.f32.xlu0 %v353_v6 }
 0x13e   : > { %v355_v16 = vpop.xlane.xlu0 %354 }
 0x13f   : > { %v356_v17 = vmul.f32 0.03125, %v355_v16 }
 0x141   : > { %v357_v18 = vadd.f32 1e-05, %v356_v17 }
 0x143   : > { %824 = vrsqrt.f32 %v357_v18 }
 0x14d   : > { %v825_v19 = vpop.eup %824 }
 0x14e   : > { %v359_v21 = vmul.f32 %v825_v19, %v351_v4 }
 0x150   : > { %v367_v23 = vmul.f32 %v698_v20, %v359_v21 }
 0x152   : > { %v375_v24 = vadd.f32 %v699_v22, %v367_v23 }
 0x154   : > { %v376_v25 = vpack.c.bf16 %v375_v24, %v375_v24 }
 0x156   : > { %378 = vst.msk [vmem:[#allocation2] sm:$0xf] %vm377_vm2, %v376_v25 }
 0x15d   : > { %v388_v26 = vld [vmem:[#allocation2] sm:$0xf] }
 0x15e   : > { %734 = vmatmul.mubr.msk.bf16.vlgmr.msra.gmra.mrb[0].mxu0 %vm345_vm0, %v388_v26 }
 0x231   : > { %v450_v32 = vpop.f32.mrb[0].mxu0 }
 0x232   : > { %v451_v33 = vadd.f32 %v701_v31, %v450_v32  ;;  %v735_v34 = vpop.f32.mrb[1].mxu0 }
 0x233   : > { %v453_v35 = vpop.f32.mrb[2].mxu0 }
 0x234   : > { %v456_v36 = vmax.f32 %v451_v33, 0.0  ;;  %v736_v37 = vpop.f32.mrb[3].mxu0 }
 0x236   : > { %v458_v38 = vpack.c.bf16 %v456_v36, %v456_v36 }
 0x238   : > { %754 = vmatmul.mubr.bf16.vlgmr.msra.gmra.mrb[0].mxu1 %v458_v38 }
 0x30b   : > { %v557_v40 = vpop.f32.mrb[0].mxu1 }
 0x30c   : > { %v563_v41 = vadd.f32 %v557_v40, %v457_v39  ;;  %v755_v42 = vpop.f32.mrb[1].mxu1 }
 0x30d   : > { %v560_v43 = vpop.f32.mrb[2].mxu1 }
 0x30e   : > { %564 = vst.msk [vmem:[%s321_s22] sm:$0xff] %vm345_vm0, %v563_v41  ;;  %v756_v44 = vpop.f32.mrb[3].mxu1 }
 0x30f   : > { %839 = shalt.err (!%p836_p5)
}
 0x310   : > { %s840_s20 = scalar_lea.hbm %s1060_s16, 128  ;;  %s844_s30 = scalar_lea.hbm %s1115_s7, 256 }
 0x311   : > { %p841_p6 = scmp.ne.s32.totalorder %s1060_s16, %s840_s20  ;;  %p845_p10 = scmp.lt.u32.totalorder %s1060_s16, %s1115_s7 }
 0x312   : > { %p846_p11 = scmp.lt.u32.totalorder %s844_s30, %s840_s20  ;;  %p848_p13 = scmp.lt.u32.totalorder %s840_s20, %s1060_s16 }
 0x313   : > { %p842_p7 = pnand %p841_p6, %p989_p4 }
 0x314   : > { %p847_p12 = por %p846_p11, %p845_p10 }
 0x315   : > { %p843_p9 = pneg %p842_p7 }
 0x316   : > { %p849_p0 = por %p848_p13, %p847_p12 }
 0x318   : > { %p850_p1 = pnand %p849_p0, %p843_p9 }
 0x31a   : > { %853 = shalt.err (!%p850_p1)
}
 0x31b   : > { %757 = dma.vmem_to_hbm [thread:$0]  (%p989_p4), %s1062_s10, 128, %s1060_s16, %s566_s17  }
 0x31c PF: > { %p763_p2 = scmp.ge.s32.totalorder %s904_s29, 2  ;;  %s591_s15 = sand.u32 1, %s884_s24  }
 0x31d   : > { %s592_s27 = scalar_lea.sflag [#allocation4], %s591_s15 }
 0x31e   : > { %p760_p3 = pnand %p763_p2, %p996_p8 }
 0x320   : > { %879 = dma.done.wait (!%p760_p3), %s592_s27, 128  }
 0x321   : > { %881 = vsyncadd (!%p760_p3), %s592_s27, 4294967168  ;;  %s20_s29 = sadd.s32 1, %s904_s29   ;;  %s1118_s24 = smov %s888_s25 }
 0x322   : > { %p17_p5 = scmp.ge.s32.totalorder %s20_s29, 4   ;;  %s1119_s25 = smov %s892_s26 }
 0x323   : > { %s1120_s26 = smov %s1002_s14  ;;  %s1121_s27 = smov %s900_s28 }
 0x324   : > { %s1122_s28 = smov %s1124_s9  ;;  %19 = sbr.rel (!%p17_p5) target bundleno = 4 (0x4), region = 96 }
 0x32b   :  { %597 = vsyncpa [#allocation4], 1 }
 0x32c   :  { %599 = vsyncpa [#allocation4 + $0x1], 1 }

</bundles_post_ra>
